<compile_context>
chip_gen: v6e
topology: v6e:2x2x1
jax: 0.10.0
libtpu: 0.0.40
codegen_flags: <defaults>
</compile_context>

<pallas_src>
import math
from typing import NamedTuple

import jax
import jax.numpy as jnp
from jax.experimental import pallas as pl
from jax.experimental.pallas import tpu as pltpu


# ---------------------------------------------------------------------------
# Parameter init (matches PyTorch __init__)
# ---------------------------------------------------------------------------
def build_pe_table(d_model: int, max_len: int = 128, dtype=jnp.float32) -> jnp.ndarray:
    half_dim = d_model // 2
    if half_dim <= 1:
        raise ValueError("d_model must be >= 4 (half_dim - 1 would be zero).")
    max_len = max_len + 2
    scale = math.log(10000.0) / (half_dim - 1)
    inv_freq = jnp.exp(jnp.arange(half_dim, dtype=jnp.float32) * (-scale))
    ang = jnp.arange(max_len, dtype=jnp.float32)[:, None] * inv_freq[None, :]
    pe = jnp.concatenate([jnp.sin(ang), jnp.cos(ang)], axis=1).reshape(max_len, -1)
    if d_model % 2 == 1:
        pe = jnp.concatenate([pe, jnp.zeros((max_len, 1), jnp.float32)], axis=1)
    pe = pe.at[0, :].set(0.0)  # padding position (index 0) is all zeros
    return pe.astype(dtype)


# ---------------------------------------------------------------------------
# Planning: fold factor, tile sizes, generation-aware budgets
# ---------------------------------------------------------------------------
def _round_down(x: int, m: int) -> int:
    return (x // m) * m


def _tpu_budgets():
    """(vmem_limit_bytes, target_block_bytes), generation aware."""
    try:
        info = pltpu.get_tpu_info()
        vmem = int(getattr(info, "vmem_capacity_bytes", 0) or 0)
    except Exception:
        vmem = 0
    if vmem >= 128 * 1024 * 1024:        # v5e / v6e (128 MiB VMEM)
        return 64 * 1024 * 1024, 8 * 1024 * 1024
    # v7x (64 MiB physical VMEM) or unknown chip -> conservative settings
    return 32 * 1024 * 1024, 4 * 1024 * 1024


def _choose_fold(batch: int, seq_len: int, itemsize: int) -> int:
    """Fold factor g: view x as (B*g, (L//g)*E) so small batches fill sublanes."""
    desired = max(8, 32 // itemsize)      # 8 for f32, 16 for bf16, 32 for int8
    if batch >= desired or seq_len < 8:
        return 1
    cands = [g for g in range(8, seq_len + 1, 8) if seq_len % g == 0]
    if not cands:
        return 1
    for g in cands:                        # smallest multiple-of-8 fold that
        if g >= desired:                   # fills the sublanes
            return g
    return cands[-1]


def _plan_tiles(rows: int, cols: int, g: int, itemsize: int, target_block_bytes: int):
    # When folded, the pe/pos blocks are full-height (g rows) rather than 1 row,
    # so halve the per-block byte target to keep the double-buffered total safe.
    if g > 1:
        target_block_bytes //= 2

    # --- row (sublane) tile -------------------------------------------------
    if g > 1:
        bt = g                    # one batch element per row block (pe rows == x rows)
    elif rows <= 8:
        bt = rows                 # full extent (legal even when < 8)
    else:
        bt = max(8, min(_round_down(rows, 8), 64))

    # --- column (lane) tile: 128-multiples whenever possible ----------------
    target_elems = max(128, target_block_bytes // itemsize)
    max_tn = max(128, _round_down(target_elems // max(bt, 1), 128))
    if cols <= 128:
        tn = cols                                   # full extent (tiny width)
    elif cols % 128 == 0:
        tn = min(cols, max_tn)
    else:
        tn = min(_round_down(cols, 128), max_tn)    # padded edge block covers tail

    # --- guarantee >= 2 grid blocks when the problem is non-trivial (v7x) ---
    total_bytes = rows * cols * itemsize
    while (total_bytes > 2 * 1024 * 1024
           and pl.cdiv(rows, bt) * pl.cdiv(cols, tn) < 2):
        if tn >= 256:
            tn = max(128, _round_down(tn // 2, 128))
        elif g == 1 and bt >= 16:
            bt = max(8, _round_down(bt // 2, 8))
        else:
            break
    return bt, tn


class PEPlan(NamedTuple):
    batch: int
    seq_len: int
    emb_dim: int
    g: int           # fold factor
    rows: int        # batch * g
    cols: int        # (seq_len // g) * emb_dim
    bt: int          # row-block size
    tn: int          # column-block size
    vmem_limit_bytes: int
    pe_slab: jax.Array    # (g, cols), x dtype
    pos_slab: jax.Array   # (g, cols), int32, 0-based sequence position


def prepare_positional_encoding(pe_table, batch: int, seq_len: int, dtype=jnp.float32) -> PEPlan:
    """Build the lane-dense PE / position slabs + tiling plan once (not hot path)."""
    max_rows, d_model = pe_table.shape
    assert seq_len + 1 <= max_rows, (
        f"seq_len={seq_len} exceeds max_len={max_rows - 2} of the PE table")
    itemsize = jnp.dtype(dtype).itemsize
    vmem_limit, target_block = _tpu_budgets()

    g = _choose_fold(batch, seq_len, itemsize)
    rows = batch * g
    cols = (seq_len // g) * d_model
    bt, tn = _plan_tiles(rows, cols, g, itemsize, target_block)

    pe_slab = pe_table[1:seq_len + 1, :].astype(dtype).reshape(g, cols)
    pos_slab = jnp.broadcast_to(
        jnp.arange(seq_len, dtype=jnp.int32)[:, None], (seq_len, d_model)
    ).reshape(g, cols)
    return PEPlan(batch, seq_len, d_model, g, rows, cols, bt, tn,
                  vmem_limit, pe_slab, pos_slab)


# ---------------------------------------------------------------------------
# Kernels (pure HBM streaming; no divides, no gathers)
# ---------------------------------------------------------------------------
def _pe_add_kernel(x_ref, pe_ref, o_ref):
    # x/o: (bt, tn); pe: (g, tn) with g == 1 (broadcast) or g == bt (elementwise)
    o_ref[...] = x_ref[...] + pe_ref[...].astype(o_ref.dtype)


def _pe_bcast_kernel(pe_ref, o_ref):
    o_ref[...] = jnp.broadcast_to(pe_ref[...].astype(o_ref.dtype), o_ref.shape)


def _pe_lens_add_kernel(x_ref, pe_ref, pos_ref, lens_ref, o_ref):
    # pos: (g, tn) int32; lens: (bt, 1) int32 -> mask broadcasts to (bt, tn)
    mask = pos_ref[...] < lens_ref[...]
    pe = jnp.where(mask, pe_ref[...], 0.0)
    o_ref[...] = x_ref[...] + pe.astype(o_ref.dtype)


def _pe_lens_bcast_kernel(pe_ref, pos_ref, lens_ref, o_ref):
    mask = pos_ref[...] < lens_ref[...]
    pe = jnp.where(mask, pe_ref[...], 0.0)
    o_ref[...] = jnp.broadcast_to(pe, o_ref.shape).astype(o_ref.dtype)


# ---------------------------------------------------------------------------
# Wrapper (forward pass, eval mode)
# ---------------------------------------------------------------------------
def positional_encoding(x, plan: PEPlan, input_lens=None, residual=True, donate_x=False):
    """
    x:          (B, L, E)
    plan:       PEPlan from prepare_positional_encoding(pe_table, B, L, x.dtype)
    input_lens: optional (B,) int valid lengths (positions past length -> PE row 0)
    returns:    (B, L, E)
    """
    B, L, E = x.shape
    assert (B, L, E) == (plan.batch, plan.seq_len, plan.emb_dim), "plan/input mismatch"
    g, rows, cols, bt, tn = plan.g, plan.rows, plan.cols, plan.bt, plan.tn

    pe_slab = plan.pe_slab
    if pe_slab.dtype != x.dtype:
        pe_slab = pe_slab.astype(x.dtype)

    x2d = x.reshape(rows, cols)
    # Batch/row axis is the INNER grid axis so the pe/pos block index (a function
    # of the column tile only) stays constant across consecutive steps.
    grid = (pl.cdiv(cols, tn), pl.cdiv(rows, bt))

    x_spec = pl.BlockSpec((bt, tn), lambda nj, bi: (bi, nj))
    pe_spec = pl.BlockSpec((g, tn), lambda nj, bi: (0, nj))
    out_spec = pl.BlockSpec((bt, tn), lambda nj, bi: (bi, nj))

    operands, in_specs = [], []
    if residual:
        operands.append(x2d)
        in_specs.append(x_spec)
    operands.append(pe_slab)
    in_specs.append(pe_spec)

    if input_lens is None:
        kernel = _pe_add_kernel if residual else _pe_bcast_kernel
    else:
        lens_rows = jnp.repeat(input_lens.astype(jnp.int32), g).reshape(rows, 1)
        operands += [plan.pos_slab, lens_rows]
        in_specs += [pl.BlockSpec((g, tn), lambda nj, bi: (0, nj)),
                     pl.BlockSpec((bt, 1), lambda nj, bi: (bi, 0))]
        kernel = _pe_lens_add_kernel if residual else _pe_lens_bcast_kernel

    io_alias = {0: 0} if (residual and donate_x) else {}

    out2d = pl.pallas_call(
        kernel,
        out_shape=jax.ShapeDtypeStruct((rows, cols), x.dtype),
        grid=grid,
        in_specs=in_specs,
        out_specs=out_spec,
        input_output_aliases=io_alias,
        compiler_params=pltpu.CompilerParams(
            dimension_semantics=("parallel", "parallel"),
            vmem_limit_bytes=plan.vmem_limit_bytes,
        ),
    )(*operands)

    return out2d.reshape(B, L, E)


# ---------------------------------------------------------------------------
# Pure-JAX reference (matches the PyTorch forward in eval mode)
# ---------------------------------------------------------------------------
def _reference(x, pe_table, input_lens=None, residual=True):
    B, L, E = x.shape
    if input_lens is None:
        input_pos = jnp.broadcast_to(jnp.arange(1, L + 1, dtype=jnp.int32), (B, L))
    else:
        idx = jnp.arange(L, dtype=jnp.int32)[None, :]
        input_pos = jnp.where(idx < input_lens[:, None], idx + 1, 0)
    gathered = pe_table[input_pos].astype(x.dtype)
    return gathered + x if residual else gathered


if __name__ == "__main__":
    key = jax.random.PRNGKey(0)
    k1, k2 = jax.random.split(key)

    # ---- config 1: small batch (exercises the sequence-axis fold, g=8) ----
    B, L, E = 2, 16, 32
    x = jax.random.normal(k1, (B, L, E), dtype=jnp.float32)
    input_lens = jnp.array([16, 10], dtype=jnp.int32)
    pe_table = build_pe_table(E, max_len=128)
    plan = prepare_positional_encoding(pe_table, batch=B, seq_len=L, dtype=x.dtype)

    out1 = jax.block_until_ready(positional_encoding(x, plan, None, residual=True))
    assert jnp.allclose(out1, _reference(x, pe_table, None, True), atol=1e-5, rtol=1e-5)

    out2 = jax.block_until_ready(positional_encoding(x, plan, input_lens, residual=True))
    assert jnp.allclose(out2, _reference(x, pe_table, input_lens, True), atol=1e-5, rtol=1e-5)

    out3 = jax.block_until_ready(positional_encoding(x, plan, input_lens, residual=False))
    assert jnp.allclose(out3, _reference(x, pe_table, input_lens, False), atol=1e-5, rtol=1e-5)

    out4 = jax.block_until_ready(positional_encoding(x, plan, None, residual=False))
    assert jnp.allclose(out4, _reference(x, pe_table, None, False), atol=1e-5, rtol=1e-5)

    # residual path with donated x (input_output_aliases={0: 0})
    donate_fn = jax.jit(
        lambda xx: positional_encoding(xx, plan, None, residual=True, donate_x=True),
        donate_argnums=(0,))
    out5 = jax.block_until_ready(donate_fn(jnp.array(x)))
    assert jnp.allclose(out5, _reference(x, pe_table, None, True), atol=1e-5, rtol=1e-5)

    # ---- config 2: bigger batch, awkward width (edge blocks, g=1) ----------
    B2, L2, E2 = 20, 31, 64
    x2 = jax.random.normal(k2, (B2, L2, E2), dtype=jnp.float32)
    lens2 = jnp.minimum(jnp.arange(1, B2 + 1, dtype=jnp.int32) * 2, L2)
    pe_table2 = build_pe_table(E2, max_len=128)
    plan2 = prepare_positional_encoding(pe_table2, batch=B2, seq_len=L2, dtype=x2.dtype)

    out6 = jax.block_until_ready(positional_encoding(x2, plan2, None, residual=True))
    assert jnp.allclose(out6, _reference(x2, pe_table2, None, True), atol=1e-5, rtol=1e-5)

    out7 = jax.block_until_ready(positional_encoding(x2, plan2, lens2, residual=True))
    assert jnp.allclose(out7, _reference(x2, pe_table2, lens2, True), atol=1e-5, rtol=1e-5)

    print("KERNEL_OK")
</pallas_src>

<mosaic_0001>
module attributes {stable_mosaic.version = 11 : i64} {
  func.func @_pe_add_kernel(%arg0: i32, %arg1: i32, %arg2: memref<8x64xf32, #tpu.memory_space<vmem>>, %arg3: memref<8x64xf32, #tpu.memory_space<vmem>>, %arg4: memref<8x64xf32, #tpu.memory_space<vmem>>) attributes {dimension_semantics = [#tpu.dimension_semantics<parallel>, #tpu.dimension_semantics<parallel>], iteration_bounds = array<i64: 1, 2>, scalar_prefetch = 0 : i64, scratch_operands = 0 : i64, tpu.core_type = #tpu.core_type<tc>, window_params = [{transform_indices = @transform_0, window_bounds = array<i64: 8, 64>}, {transform_indices = @transform_1, window_bounds = array<i64: 8, 64>}, {transform_indices = @transform_2, window_bounds = array<i64: 8, 64>}]} {
    %c0 = arith.constant 0 : index
    %c0_0 = arith.constant 0 : index
    %0 = vector.load %arg2[%c0, %c0_0] : memref<8x64xf32, #tpu.memory_space<vmem>>, vector<8x64xf32>
    %c0_1 = arith.constant 0 : index
    %c0_2 = arith.constant 0 : index
    %1 = vector.load %arg3[%c0_1, %c0_2] : memref<8x64xf32, #tpu.memory_space<vmem>>, vector<8x64xf32>
    %2 = arith.addf %0, %1 : vector<8x64xf32>
    %c0_3 = arith.constant 0 : index
    %c0_4 = arith.constant 0 : index
    %3 = vector.load %arg4[%c0_3, %c0_4] : memref<8x64xf32, #tpu.memory_space<vmem>>, vector<8x64xf32>
    tpu.vector_store %arg4[%c0_3, %c0_4], %2 {strides = array<i32>} : memref<8x64xf32, #tpu.memory_space<vmem>>, vector<8x64xf32>,
    return
  }
  func.func @transform_0(%arg0: i32, %arg1: i32) -> (i32, i32) {
    %c0_i32 = arith.constant 0 : i32
    return %arg1, %arg0 : i32, i32
  }
  func.func @transform_1(%arg0: i32, %arg1: i32) -> (i32, i32) {
    %c0_i32 = arith.constant 0 : i32
    %c0_i32_0 = arith.constant 0 : i32
    return %c0_i32, %arg0 : i32, i32
  }
  func.func @transform_2(%arg0: i32, %arg1: i32) -> (i32, i32) {
    %c0_i32 = arith.constant 0 : i32
    return %arg1, %arg0 : i32, i32
  }
}

</mosaic_0001>

<bundles_post_ra>
// kernel: tpu_custom_call.1
= control target key start
LH: loop header
LB: loop body
LE: loop exit
PB: predicated region body
PF: predicated region fallthrough
CT: control target
= control target key end

     0   :  { %7 = vsyncpa [#allocation3], 0  ;;  %s715_s0 = inlined_call_operand.hbm [shape: f32[16,64], index: 0, kind: input, shape index: {}]   ;;  %s716_s1 = inlined_call_operand.hbm [shape: f32[8,64], index: 1, kind: input, shape index: {}]   ;;  %s717_s2 = inlined_call_operand.hbm [shape: f32[16,64], index: 2, kind: output, shape index: {}]  }
   0x1   :  { %9 = vsyncpa [#allocation3 + $0x1], 0 }
   0x2   :  { %10 = vsyncpa [#allocation6], 0 }
   0x3   :  { %11 = vsyncpa [#allocation4], 0 }
   0x4   :  { %13 = vsyncpa [#allocation4 + $0x1], 0  ;;  %s554_s9 = smov 0   ;;  %s556_s10 = smov 0  }
   0x5   :  { %s558_s11 = smov 0   ;;  %s560_s12 = smov 0  }
   0x6   :  { %s562_s13 = smov 0   ;;  %s564_s14 = smov 0  }
   0x7 LB: > { %s308_s15 = sadd.s32 4294967295, %s534_s14   ;;  %s309_s16 = sadd.s32 4294967294, %s534_s14   ;;  %s534_s14 = sphi %s564_s14, %s19_s14   ;;  %s530_s13 = sphi %s562_s13, %s734_s13   ;;  %s526_s12 = sphi %s560_s12, %s733_s12   ;;  %s522_s11 = sphi %s558_s11, %s732_s11   ;;  %s518_s10 = sphi %s556_s10, %s731_s10   ;;  %s514_s9 = sphi %s554_s9, %s730_s9  }
   0x8   : > { %p53_p0 = scmp.ne.s32.totalorder %s518_s10, %s514_s9  ;;  %p588_p1 = scmp.eq.s32.totalorder %s308_s15, 0 }
   0x9   : > { %p592_p2 = scmp.eq.s32.totalorder %s308_s15, 1  ;;  %p111_p3 = scmp.eq.s32.totalorder %s309_s16, 1 }
   0xa   : > { %p598_p4 = por %p588_p1, %p53_p0  ;;  %p310_p5 = scmp.ge.s32.totalorder %s534_s14, 1 }
   0xb   : > { %p603_p6 = por %p111_p3, %p53_p0  ;;  %p118_p7 = scmp.lt.s32.totalorder %s534_s14, 3 }
   0xc   : > { %s721_s19 = scalar_select %p598_p4, 1, 0 }
   0xd   : > { %s722_s20 = scalar_select %p603_p6, 1, 0 }
   0xe   : > { %p608_p8 = pnand %p310_p5, %p118_p7  ;;  %s536_s22 = smov [#allocation5]  }
   0xf   : > { %s133_s23 = sshll.u32 %s536_s22, 4  ;;  %s28_s25 = sadd.s32 1, %s530_s13  ;;  %s134_s23 = int_to_ptr.vmem [resolvable:$true] %s133_s23 }
  0x10   : > { %p331_p10 = pneg %p608_p8  ;;  %s40_s26 = sadd.s32 1, %s522_s11 }
  0x11   : > { %p29_p12 = scmp.ge.s32.totalorder %s28_s25, 2  ;;  %s407_s27 = scalar_lea.vmem %s134_s23, 128 }
  0x12   : > { %p617_p11 = pnand %p331_p10, %p588_p1  ;;  %p408_p0 = scmp.ne.s32.totalorder %s134_s23, %s407_s27 }
  0x13   : > { %p415_p7 = scmp.lt.s32.totalorder %s134_s23, %s134_s23  ;;  %p416_p6 = scmp.lt.s32.totalorder %s407_s27, %s407_s27 }
  0x14   : > { %p398_p13 = pneg %p617_p11 }
  0x15   : > { %p417_p9 = por %p416_p6, %p415_p7 }
  0x16   : > { %p410_p3 = pnand %p408_p0, %p398_p13 }
  0x18   : > { %p411_p5 = pneg %p410_p3 }
  0x1a   : > { %p418_p4 = pnand %p417_p9, %p411_p5 }
  0x1c   : > { %421 = shalt.err (!%p418_p4)
}
  0x1d   : > { %334 = dma.hbm_to_vmem [thread:$0]  (!%p617_p11), %s716_s1, 128, %s134_s23, [#allocation6]  }
  0x1e   : > { %s736_s25 = smov (%p29_p12, %s28_s25), 0  ;;  %p47_p6 = scmp.ne.s32.totalorder %s522_s11, %s518_s10 }
  0x1f   : > { %p48_p4 = scmp.eq.s32.totalorder %s534_s14, 0  ;;  %s35_s30 = ssub.s32 %s530_s13, %s736_s25 }
  0x20   : > { %p344_p9 = scmp.lt.s32.totalorder %s534_s14, 2  ;;  %p38_p10 = scmp.eq.s32.totalorder %s35_s30, 0 }
  0x21   : > { %p49_p13 = por %p48_p4, %p47_p6  ;;  %p640_p0 = por %p592_p2, %p47_p6 }
  0x22   : > { %s144_s4 = sand.u32 1, %s522_s11   ;;  %s314_s7 = sshll.u32 %s530_s13, 7 }
  0x23   : > { %s646_s5 = scalar_select %p38_p10, %s522_s11, %s40_s26  }
  0x24   : > { %s313_s6 = sshll.u32 %s144_s4, 3  ;;  %s154_s16 = scalar_lea.hbm %s715_s0, %s314_s7 }
  0x25   : > { %s148_s22 = scalar_lea.vmem [#allocation2], %s313_s6  ;;  %p652_p11 = pnand %p344_p9, %p49_p13 }
  0x26   : > { %s156_s23 = sshll.u32 %s148_s22, 4  ;;  %s145_s18 = scalar_lea.sflag [#allocation3], %s144_s4  ;;  %s157_s23 = int_to_ptr.vmem [resolvable:$true] %s156_s23 }
  0x27   : > { %p424_p2 = pneg %p652_p11  ;;  %s435_s27 = scalar_lea.vmem %s157_s23, 128 }
  0x28   : > { %p436_p12 = scmp.ne.s32.totalorder %s157_s23, %s435_s27  ;;  %s537_s26 = smov [#allocation2]  }
  0x29   : > { %s440_s28 = sshll.u32 %s537_s26, 4  ;;  %s441_s28 = int_to_ptr.vmem [resolvable:$false] %s440_s28 }
  0x2a   : > { %p438_p3 = pnand %p436_p12, %p424_p2  ;;  %s442_s29 = scalar_lea.vmem %s441_s28, 256 }
  0x2b   : > { %p443_p7 = scmp.lt.s32.totalorder %s157_s23, %s441_s28  ;;  %p444_p6 = scmp.lt.s32.totalorder %s442_s29, %s435_s27 }
  0x2c   : > { %p439_p5 = pneg %p438_p3 }
  0x2d   : > { %p445_p4 = por %p444_p6, %p443_p7 }
  0x2f   : > { %p446_p10 = pnand %p445_p4, %p439_p5 }
  0x31   : > { %449 = shalt.err (!%p446_p10)
}
  0x32   : > { %338 = dma.hbm_to_vmem [thread:$0]  (!%p652_p11), %s154_s16, 128, %s157_s23, %s145_s18  }
  0x33   : > { %165 = sbr.rel (%p608_p8) target bundleno = 83 (0x53), region = 28  ;;  %s663_s30 = sand.u32 (!%p608_p8), 1, %s518_s10  }
  0x34   : > { %s316_s4 = sshll.u32 (!%p608_p8), %s663_s30, 3  ;;  %s168_s6 = scalar_lea.sflag (!%p608_p8), [#allocation3], %s663_s30 }
  0x35   : > { %s171_s7 = scalar_lea.vmem (!%p608_p8), [#allocation2], %s316_s4  ;;  %p727_p9 = scmp.ne.s32.totalorder (!%p608_p8), %s721_s19, 0 }
  0x38   : > { %501 = dma.done.wait (%p727_p9), %s168_s6, 128  }
  0x39   : > { %503 = vsyncadd (%p727_p9), %s168_s6, 4294967168 }
  0x3a   : > { %505 = dma.done.wait (%p588_p1), [#allocation6], 128  }
  0x3b   : > { %507 = vsyncadd (%p588_p1), [#allocation6], 4294967168  ;;  %s195_s21 = scalar_lea.vmem [#allocation7], %s316_s4  ;;  %s320_s15 = sshll.u32 %s526_s12, 7  ;;  %v196_v0 = vld [vmem:[%s171_s7] sm:$0xff]  ;;  %v197_v1 = vld [vmem:[#allocation5] sm:$0xff] }
  0x3c   : > { %s216_s8 = sshll.u32 %s195_s21, 4  ;;  %vm199_vm0 = vcmask 523264   ;;  %v198_v2 = vadd.f32 %v197_v1, %v196_v0  ;;  %s214_s22 = scalar_lea.hbm %s717_s2, %s320_s15  ;;  %s217_s8 = int_to_ptr.vmem [resolvable:$true] %s216_s8 }
  0x3d   : > { %s202_s23 = scalar_lea.sflag [#allocation4], %s663_s30  ;;  %s450_s24 = scalar_lea.vmem %s217_s8, 128 }
  0x3e   : > { %200 = vst.msk [vmem:[%s195_s21] sm:$0xff] %vm199_vm0, %v198_v2  ;;  %p451_p8 = scmp.ne.s32.totalorder %s217_s8, %s450_s24  ;;  %s538_s17 = smov [#allocation7]  }
  0x3f   : > { %s454_s18 = sshll.u32 %s538_s17, 4  ;;  %s455_s18 = int_to_ptr.vmem [resolvable:$false] %s454_s18 }
  0x40   : > { %p452_p1 = pnand %p451_p8, %p640_p0  ;;  %s456_s12 = scalar_lea.vmem %s455_s18, 256 }
  0x41   : > { %p457_p11 = scmp.lt.s32.totalorder %s217_s8, %s455_s18  ;;  %p458_p2 = scmp.lt.s32.totalorder %s456_s12, %s450_s24 }
  0x42   : > { %p453_p13 = pneg %p452_p1 }
  0x43   : > { %p459_p12 = por %p458_p2, %p457_p11 }
  0x45   : > { %p460_p3 = pnand %p459_p12, %p453_p13 }
  0x47   : > { %463 = shalt.err (!%p460_p3)
}
  0x48   : > { %s464_s27 = scalar_lea.hbm %s214_s22, 128  ;;  %s468_s29 = scalar_lea.hbm %s717_s2, 256 }
  0x49   : > { %p465_p5 = scmp.ne.s32.totalorder %s214_s22, %s464_s27  ;;  %p469_p4 = scmp.lt.s32.totalorder %s214_s22, %s717_s2 }
  0x4a   : > { %p470_p10 = scmp.lt.s32.totalorder %s468_s29, %s464_s27 }
  0x4b   : > { %p466_p7 = pnand %p465_p5, %p640_p0 }
  0x4c   : > { %p471_p9 = por %p470_p10, %p469_p4 }
  0x4d   : > { %p467_p6 = pneg %p466_p7 }
  0x4f   : > { %p472_p8 = pnand %p471_p9, %p467_p6 }
  0x51   : > { %475 = shalt.err (!%p472_p8)
}
  0x52   : > { %329 = dma.vmem_to_hbm [thread:$0]  (%p640_p0), %s217_s8, 128, %s214_s22, %s202_s23  }
  0x53 PF: > { %s228_s6 = sand.u32 1, %s514_s9   ;;  %p728_p1 = scmp.ne.s32.totalorder %s722_s20, 0 }
  0x54   : > { %p729_p13 = scmp.ge.s32.totalorder %s534_s14, 2  ;;  %s229_s7 = scalar_lea.sflag [#allocation4], %s228_s6 }
  0x56   : > { %p340_p11 = pnand %p729_p13, %p728_p1 }
  0x58   : > { %p341_p2 = pneg %p340_p11 }
  0x5a   : > { %509 = dma.done.wait (%p341_p2), %s229_s7, 128  }
  0x5b   : > { %511 = vsyncadd (%p341_p2), %s229_s7, 4294967168  ;;  %s19_s14 = sadd.s32 1, %s534_s14   ;;  %s730_s9 = smov %s518_s10 }
  0x5c   : > { %p16_p12 = scmp.ge.s32.totalorder %s19_s14, 4   ;;  %s731_s10 = smov %s522_s11 }
  0x5d   : > { %s732_s11 = smov %s646_s5  ;;  %s733_s12 = smov %s530_s13 }
  0x5e   : > { %s734_s13 = smov %s736_s25  ;;  %18 = sbr.rel (!%p16_p12) target bundleno = 7 (0x7), region = 78 }
  0x63   :  { %234 = vsyncpa [#allocation3], 1 }
  0x64   :  { %236 = vsyncpa [#allocation3 + $0x1], 1 }
  0x65   :  { %237 = vsyncpa [#allocation6], 1 }
  0x66   :  { %238 = vsyncpa [#allocation4], 1 }
  0x67   :  { %240 = vsyncpa [#allocation4 + $0x1], 1 }

</bundles_post_ra>
